<compile_context>
chip_gen: v5e
topology: v5e:2x2
jax: 0.10.0
libtpu: 0.0.40
codegen_flags: <defaults>
</compile_context>

<pallas_src>
import math
import jax
import jax.numpy as jnp
from jax.experimental import pallas as pl
from jax.experimental.pallas import tpu as pltpu


PAD_ID = 1
LN_EPS = 1e-5
# Matmul-input dtype: bfloat16 for MXU throughput + halved weight HBM/VMEM
# traffic; accumulation stays f32.  Flip to jnp.float32 for strict parity.
MXU_DTYPE = jnp.bfloat16


# ----------------------------- in-kernel helpers ---------------------------

def _gelu(x):
    # TODO(synk): HF RoBERTa uses exact erf-GELU; tanh approximation used here.
    c = math.sqrt(2.0 / math.pi)
    return 0.5 * x * (1.0 + jnp.tanh(c * (x + 0.044715 * x * x * x)))


def _layernorm(x, g, b):
    mean = jnp.mean(x, axis=-1, keepdims=True)
    xc = x - mean
    var = jnp.mean(xc * xc, axis=-1, keepdims=True)
    return xc * jax.lax.rsqrt(var + LN_EPS) * g + b


# ----------------------------- embedding LayerNorm -------------------------

def _emb_ln_kernel(x_ref, g_ref, b_ref, o_ref):
    o_ref[...] = _layernorm(x_ref[...], g_ref[...], b_ref[...])


def embedding_layernorm(x, gamma_row, beta_row):
    """LayerNorm(x) over last dim, tiled over token rows ("parallel" grid)."""
    M, H = x.shape
    TM = 256 if M % 256 == 0 else M          # row tile; toy size -> one block
    return pl.pallas_call(
        _emb_ln_kernel,
        out_shape=jax.ShapeDtypeStruct((M, H), jnp.float32),
        grid=(M // TM,),
        in_specs=[
            pl.BlockSpec((TM, H), lambda i: (i, 0)),
            pl.BlockSpec((1, H), lambda i: (0, 0)),
            pl.BlockSpec((1, H), lambda i: (0, 0)),
        ],
        out_specs=pl.BlockSpec((TM, H), lambda i: (i, 0)),
        compiler_params=pltpu.CompilerParams(
            dimension_semantics=("parallel",)),
    )(x, gamma_row, beta_row)


# ----------------------------- fused encoder stack -------------------------

def _make_stack_kernel(H, nH):
    """One grid step = one (batch slab, layer) pair.

    The output block (the per-batch activation slab, same block index for all
    layers) acts as the VMEM-resident hidden state across the layer axis.
    """
    dH = H // nH
    scale = 1.0 / math.sqrt(dH)

    def kernel(h_ref, bias_ref, wqkv_ref, bqkv_ref, wo_ref, bo_ref,
               ln1_g_ref, ln1_b_ref, w1_ref, b1_ref, w2_ref, b2_ref,
               ln2_g_ref, ln2_b_ref, o_ref):
        l = pl.program_id(1)

        # Load the embedding output into the resident activation at layer 0.
        @pl.when(l == 0)
        def _():
            o_ref[...] = h_ref[...]

        h = o_ref[...]                                  # (S, H) f32, VMEM-resident
        S = h.shape[0]

        # Hoisted additive mask broadcast: once per layer, not once per head.
        bias_full = jnp.broadcast_to(bias_ref[...], (S, S))

        # Fused Q/K/V projection: one MXU pass with N = 3H.
        h_mx = h.astype(MXU_DTYPE)
        qkv = jnp.dot(h_mx, wqkv_ref[...],
                      preferred_element_type=jnp.float32) + bqkv_ref[...]
        qkv_mx = qkv.astype(MXU_DTYPE)                  # cast once, slice per head

        # Per-head attention, accumulated straight through the output
        # projection row-slices (no concatenate, no explicit K transpose).
        attn_acc = jnp.zeros((S, H), jnp.float32)
        for hh in range(nH):
            lo, hi = hh * dH, (hh + 1) * dH
            q_h = qkv_mx[:, lo:hi]
            k_h = qkv_mx[:, H + lo:H + hi]
            v_h = qkv_mx[:, 2 * H + lo:2 * H + hi]
            s = jax.lax.dot_general(
                q_h, k_h, (((1,), (1,)), ((), ())),      # QK^T, no .T
                preferred_element_type=jnp.float32) * scale + bias_full
            s = s - jnp.max(s, axis=-1, keepdims=True)
            p = jnp.exp(s)
            p = p * pl.reciprocal(jnp.sum(p, axis=-1, keepdims=True),
                                  approx=True)
            ctx_h = jnp.dot(p.astype(MXU_DTYPE), v_h,
                            preferred_element_type=jnp.float32)   # (S, dH)
            attn_acc = attn_acc + jnp.dot(
                ctx_h.astype(MXU_DTYPE), wo_ref[lo:hi, :],
                preferred_element_type=jnp.float32)

        attn_out = attn_acc + bo_ref[...]
        h1 = _layernorm(attn_out + h, ln1_g_ref[...], ln1_b_ref[...])

        # FFN + residual + LN
        ff = _gelu(jnp.dot(h1.astype(MXU_DTYPE), w1_ref[...],
                           preferred_element_type=jnp.float32) + b1_ref[...])
        ff = jnp.dot(ff.astype(MXU_DTYPE), w2_ref[...],
                     preferred_element_type=jnp.float32) + b2_ref[...]
        o_ref[...] = _layernorm(ff + h1, ln2_g_ref[...], ln2_b_ref[...])

    return kernel


def encoder_stack(h, bias3, packed, *, B, S, L, nH):
    """All L transformer layers in one pallas_call; h stays resident in VMEM."""
    H = h.shape[1]
    I = packed["enc_w1"].shape[2]

    per_batch = lambda b, l: (b, 0)          # activation slab: constant over l
    per_batch3 = lambda b, l: (b, 0, 0)      # mask bias: constant over l
    per_layer = lambda b, l: (l, 0, 0)       # weights: stream one layer / step

    return pl.pallas_call(
        _make_stack_kernel(H, nH),
        out_shape=jax.ShapeDtypeStruct((B * S, H), jnp.float32),
        grid=(B, L),
        in_specs=[
            pl.BlockSpec((S, H), per_batch),                 # h (embeddings)
            pl.BlockSpec((None, 1, S), per_batch3),          # additive mask bias
            pl.BlockSpec((None, H, 3 * H), per_layer),       # wqkv (bf16)
            pl.BlockSpec((None, 1, 3 * H), per_layer),       # bqkv
            pl.BlockSpec((None, H, H), per_layer),           # wo (bf16)
            pl.BlockSpec((None, 1, H), per_layer),           # bo
            pl.BlockSpec((None, 1, H), per_layer),           # ln1_g
            pl.BlockSpec((None, 1, H), per_layer),           # ln1_b
            pl.BlockSpec((None, H, I), per_layer),           # w1 (bf16)
            pl.BlockSpec((None, 1, I), per_layer),           # b1
            pl.BlockSpec((None, I, H), per_layer),           # w2 (bf16)
            pl.BlockSpec((None, 1, H), per_layer),           # b2
            pl.BlockSpec((None, 1, H), per_layer),           # ln2_g
            pl.BlockSpec((None, 1, H), per_layer),           # ln2_b
        ],
        out_specs=pl.BlockSpec((S, H), per_batch),
        compiler_params=pltpu.CompilerParams(
            dimension_semantics=("parallel", "arbitrary"),
            vmem_limit_bytes=64 * 1024 * 1024),
    )(h, bias3,
      packed["enc_wqkv"], packed["enc_bqkv"], packed["enc_wo"], packed["enc_bo"],
      packed["enc_ln1_g"], packed["enc_ln1_b"],
      packed["enc_w1"], packed["enc_b1"], packed["enc_w2"], packed["enc_b2"],
      packed["enc_ln2_g"], packed["enc_ln2_b"])


# ----------------------------- classifier head ------------------------------

def _head_kernel(cls_ref, pw_ref, pb_ref, mw_ref, mb_ref, o_ref):
    # pooler: tanh(W h_cls + b)
    pooled = jnp.tanh(jnp.dot(cls_ref[...].astype(MXU_DTYPE), pw_ref[...],
                              preferred_element_type=jnp.float32) + pb_ref[...])
    # mlp (H -> 1) as a VPU row-reduce instead of a degenerate N=1 MXU pass
    logit = jnp.sum(pooled * mw_ref[...], axis=-1, keepdims=True) + mb_ref[...]
    o_ref[...] = 1.0 / (1.0 + jnp.exp(-logit))


def classifier_head(cls, pooler_w, pooler_b_row, mlp_w_row, mlp_b_11):
    """Fused pooler + mlp + sigmoid on the (B, H) CLS rows."""
    B, H = cls.shape
    return pl.pallas_call(
        _head_kernel,
        out_shape=jax.ShapeDtypeStruct((B, 1), jnp.float32),
        grid=(1,),
        in_specs=[
            pl.BlockSpec((B, H), lambda i: (0, 0)),
            pl.BlockSpec((H, H), lambda i: (0, 0)),
            pl.BlockSpec((1, H), lambda i: (0, 0)),
            pl.BlockSpec((1, H), lambda i: (0, 0)),
            pl.BlockSpec((1, 1), lambda i: (0, 0)),
        ],
        out_specs=pl.BlockSpec((B, 1), lambda i: (0, 0)),
    )(cls, pooler_w, pooler_b_row, mlp_w_row, mlp_b_11)


# ----------------------------- parameters ----------------------------------

def init_params(key, vocab=100, H=128, nH=4, I=256, L=2, S=8):
    def nrm(k, shape):
        return 0.02 * jax.random.normal(k, shape, dtype=jnp.float32)

    keys = jax.random.split(key, 8 + 8 * L)
    ki = iter(keys)
    p = {
        "word_emb": nrm(next(ki), (vocab, H)),
        "pos_emb": nrm(next(ki), (S + 2, H)),   # RoBERTa positions start at pad_id+1
        "type_emb": nrm(next(ki), (1, H)),
        "emb_ln_g": jnp.ones((H,), jnp.float32),
        "emb_ln_b": jnp.zeros((H,), jnp.float32),
        "pooler_w": nrm(next(ki), (H, H)),
        "pooler_b": jnp.zeros((H,), jnp.float32),
        "mlp_w": nrm(next(ki), (H, 1)),         # self.mlp = nn.Linear(hidden, 1)
        "mlp_b": jnp.zeros((1,), jnp.float32),
        "layers": [],
    }
    for _ in range(L):
        p["layers"].append({
            # fused [Wq | Wk | Wv] projection weight / bias
            "wqkv": nrm(next(ki), (H, 3 * H)),
            "bqkv": jnp.zeros((3 * H,), jnp.float32),
            "wo": nrm(next(ki), (H, H)), "bo": jnp.zeros((H,), jnp.float32),
            "ln1_g": jnp.ones((H,), jnp.float32), "ln1_b": jnp.zeros((H,), jnp.float32),
            "w1": nrm(next(ki), (H, I)), "b1": jnp.zeros((I,), jnp.float32),
            "w2": nrm(next(ki), (I, H)), "b2": jnp.zeros((H,), jnp.float32),
            "ln2_g": jnp.ones((H,), jnp.float32), "ln2_b": jnp.zeros((H,), jnp.float32),
        })
    return p


def pack_params(params):
    """One-time host-side packing: stack per-layer weights on a leading L axis
    and cast matmul weights to MXU_DTYPE (LN params / biases stay f32)."""
    H = params["word_emb"].shape[1]
    layers = params["layers"]

    def stack(name, cast=None, as_row=False):
        a = jnp.stack([lyr[name] for lyr in layers], axis=0)
        if as_row:
            a = a[:, None, :]
        return a.astype(cast) if cast is not None else a

    packed = {
        "word_emb": params["word_emb"],
        "pos_emb": params["pos_emb"],
        "type_emb": params["type_emb"],
        "emb_ln_g": params["emb_ln_g"].reshape(1, H),
        "emb_ln_b": params["emb_ln_b"].reshape(1, H),
        "enc_wqkv": stack("wqkv", MXU_DTYPE),
        "enc_bqkv": stack("bqkv", as_row=True),
        "enc_wo": stack("wo", MXU_DTYPE),
        "enc_bo": stack("bo", as_row=True),
        "enc_ln1_g": stack("ln1_g", as_row=True),
        "enc_ln1_b": stack("ln1_b", as_row=True),
        "enc_w1": stack("w1", MXU_DTYPE),
        "enc_b1": stack("b1", as_row=True),
        "enc_w2": stack("w2", MXU_DTYPE),
        "enc_b2": stack("b2", as_row=True),
        "enc_ln2_g": stack("ln2_g", as_row=True),
        "enc_ln2_b": stack("ln2_b", as_row=True),
        "pooler_w": params["pooler_w"].astype(MXU_DTYPE),
        "pooler_b": params["pooler_b"].reshape(1, H),
        "mlp_w": params["mlp_w"].reshape(1, H),      # row vector for VPU reduce
        "mlp_b": params["mlp_b"].reshape(1, 1),
        "num_layers": len(layers),
    }
    return packed


# ----------------------------- forward pass ---------------------------------

def codebert_relevance_forward(packed, input_ids, attention_mask, nH=4):
    B, S = input_ids.shape
    H = packed["word_emb"].shape[1]
    L = packed["num_layers"]

    # --- embeddings (table gathers are XLA glue; LN is a Pallas kernel) ---
    not_pad = (input_ids != PAD_ID).astype(jnp.int32)
    pos_ids = jnp.cumsum(not_pad, axis=1) * not_pad + PAD_ID
    emb = (jnp.take(packed["word_emb"], input_ids, axis=0)
           + jnp.take(packed["pos_emb"], pos_ids, axis=0)
           + packed["type_emb"][0])
    h = emb.reshape(B * S, H).astype(jnp.float32)
    h = embedding_layernorm(h, packed["emb_ln_g"], packed["emb_ln_b"])

    # RoBERTa-style additive mask bias, precomputed once: (1 - mask) * -10000
    bias3 = ((attention_mask.astype(jnp.float32) - 1.0) * 10000.0).reshape(B, 1, S)

    # --- all encoder layers in one fused Pallas call (h resident in VMEM) ---
    h = encoder_stack(h, bias3, packed, B=B, S=S, L=L, nH=nH)

    # --- pooler + mlp + sigmoid, fused, on the [CLS] (first) token ---
    cls = h.reshape(B, S, H)[:, 0, :]
    return classifier_head(cls, packed["pooler_w"], packed["pooler_b"],
                           packed["mlp_w"], packed["mlp_b"])


# ----------------------------- driver ---------------------------------------

if __name__ == "__main__":
    B, S, H, nH, I, L, vocab = 2, 8, 128, 4, 256, 2, 100

    key = jax.random.PRNGKey(0)
    kp, kid = jax.random.split(key)
    params = init_params(kp, vocab=vocab, H=H, nH=nH, I=I, L=L, S=S)
    packed = pack_params(params)

    input_ids = jax.random.randint(kid, (B, S), 2, vocab, dtype=jnp.int32)
    # pad the tail of the second sequence to exercise the attention mask
    input_ids = input_ids.at[1, 5:].set(PAD_ID)
    attention_mask = (input_ids != PAD_ID).astype(jnp.int32)

    probs = codebert_relevance_forward(packed, input_ids, attention_mask, nH=nH)
    probs = jax.block_until_ready(probs)

    assert probs.shape == (B, 1)
    assert bool(jnp.all((probs >= 0.0) & (probs <= 1.0)))
    print("KERNEL_OK")
</pallas_src>

<mosaic_0001>
module attributes {stable_mosaic.version = 11 : i64} {
  func.func @_emb_ln_kernel(%arg0: i32, %arg1: memref<16x128xf32, #tpu.memory_space<vmem>>, %arg2: memref<1x128xf32, #tpu.memory_space<vmem>>, %arg3: memref<1x128xf32, #tpu.memory_space<vmem>>, %arg4: memref<16x128xf32, #tpu.memory_space<vmem>>) attributes {dimension_semantics = [#tpu.dimension_semantics<parallel>], iteration_bounds = array<i64: 1>, scalar_prefetch = 0 : i64, scratch_operands = 0 : i64, tpu.core_type = #tpu.core_type<tc>, window_params = [{transform_indices = @transform_0, window_bounds = array<i64: 16, 128>}, {pipeline_mode = #tpu.pipeline_mode<synchronous>, transform_indices = @transform_1, window_bounds = array<i64: 1, 128>}, {pipeline_mode = #tpu.pipeline_mode<synchronous>, transform_indices = @transform_2, window_bounds = array<i64: 1, 128>}, {transform_indices = @transform_3, window_bounds = array<i64: 16, 128>}]} {
    %c0 = arith.constant 0 : index
    %c0_0 = arith.constant 0 : index
    %0 = vector.load %arg1[%c0, %c0_0] : memref<16x128xf32, #tpu.memory_space<vmem>>, vector<16x128xf32>
    %c0_1 = arith.constant 0 : index
    %c0_2 = arith.constant 0 : index
    %1 = vector.load %arg2[%c0_1, %c0_2] : memref<1x128xf32, #tpu.memory_space<vmem>>, vector<1x128xf32>
    %c0_3 = arith.constant 0 : index
    %c0_4 = arith.constant 0 : index
    %2 = vector.load %arg3[%c0_3, %c0_4] : memref<1x128xf32, #tpu.memory_space<vmem>>, vector<1x128xf32>
    %cst = arith.constant dense<0.000000e+00> : vector<16xf32>
    %3 = vector.multi_reduction <add>, %0, %cst [1] : vector<16x128xf32> to vector<16xf32>
    %4 = vector.shape_cast %3 : vector<16xf32> to vector<16x1xf32>
    %cst_5 = arith.constant 1.280000e+02 : f32
    %5 = vector.broadcast %cst_5 : f32 to vector<16x1xf32>
    %6 = arith.divf %4, %5 : vector<16x1xf32>
    %7 = vector.broadcast %6 : vector<16x1xf32> to vector<16x128xf32>
    %8 = arith.subf %0, %7 : vector<16x128xf32>
    %9 = arith.mulf %8, %8 : vector<16x128xf32>
    %cst_6 = arith.constant dense<0.000000e+00> : vector<16xf32>
    %10 = vector.multi_reduction <add>, %9, %cst_6 [1] : vector<16x128xf32> to vector<16xf32>
    %11 = vector.shape_cast %10 : vector<16xf32> to vector<16x1xf32>
    %cst_7 = arith.constant 1.280000e+02 : f32
    %12 = vector.broadcast %cst_7 : f32 to vector<16x1xf32>
    %13 = arith.divf %11, %12 : vector<16x1xf32>
    %cst_8 = arith.constant 9.99999974E-6 : f32
    %14 = vector.broadcast %cst_8 : f32 to vector<16x1xf32>
    %15 = arith.addf %13, %14 : vector<16x1xf32>
    %16 = math.rsqrt %15 : vector<16x1xf32>
    %17 = vector.broadcast %16 : vector<16x1xf32> to vector<16x128xf32>
    %18 = arith.mulf %8, %17 : vector<16x128xf32>
    %19 = vector.broadcast %1 : vector<1x128xf32> to vector<16x128xf32>
    %20 = arith.mulf %18, %19 : vector<16x128xf32>
    %21 = vector.broadcast %2 : vector<1x128xf32> to vector<16x128xf32>
    %22 = arith.addf %20, %21 : vector<16x128xf32>
    %c0_9 = arith.constant 0 : index
    %c0_10 = arith.constant 0 : index
    %23 = vector.load %arg4[%c0_9, %c0_10] : memref<16x128xf32, #tpu.memory_space<vmem>>, vector<16x128xf32>
    tpu.vector_store %arg4[%c0_9, %c0_10], %22 {strides = array<i32>} : memref<16x128xf32, #tpu.memory_space<vmem>>, vector<16x128xf32>,
    return
  }
  func.func @transform_0(%arg0: i32) -> (i32, i32) {
    %c0_i32 = arith.constant 0 : i32
    %c0_i32_0 = arith.constant 0 : i32
    return %arg0, %c0_i32 : i32, i32
  }
  func.func @transform_1(%arg0: i32) -> (i32, i32) {
    %c0_i32 = arith.constant 0 : i32
    %c0_i32_0 = arith.constant 0 : i32
    %c0_i32_1 = arith.constant 0 : i32
    return %c0_i32, %c0_i32_0 : i32, i32
  }
  func.func @transform_2(%arg0: i32) -> (i32, i32) {
    %c0_i32 = arith.constant 0 : i32
    %c0_i32_0 = arith.constant 0 : i32
    %c0_i32_1 = arith.constant 0 : i32
    return %c0_i32, %c0_i32_0 : i32, i32
  }
  func.func @transform_3(%arg0: i32) -> (i32, i32) {
    %c0_i32 = arith.constant 0 : i32
    %c0_i32_0 = arith.constant 0 : i32
    return %arg0, %c0_i32 : i32, i32
  }
}

</mosaic_0001>

<bundles_post_ra>
// kernel: tpu_custom_call.1
= control target key start
LH: loop header
LB: loop body
LE: loop exit
PB: predicated region body
PF: predicated region fallthrough
CT: control target
= control target key end

     0   :  { %8 = vsyncpa [#allocation3], 0  ;;  %s264_s0 = inlined_call_operand.hbm [shape: f32[16,128], index: 0, kind: input, shape index: {}]   ;;  %s265_s1 = inlined_call_operand.hbm [shape: f32[1,128], index: 1, kind: input, shape index: {}]   ;;  %s266_s2 = inlined_call_operand.vmem [shape: f32[1,128], index: 2, kind: input, shape index: {}]   ;;  %s267_s3 = inlined_call_operand.hbm [shape: f32[16,128], index: 3, kind: output, shape index: {}]  }
   0x1   :  { %9 = vsyncpa [#allocation6], 0 }
   0x2   :  { %10 = vsyncpa [#allocation4], 0  ;;  %s15_s14 = sshll.u32 %s264_s0, 4  ;;  %s220_s15 = smov [#allocation2]   ;;  %s16_s14 = int_to_ptr.hbm [resolvable:$true] %s15_s14 }
   0x3   :  { %s17_s16 = sshll.u32 %s220_s15, 4  ;;  %s29_s19 = sshll.u32 %s265_s1, 4  ;;  %s18_s16 = int_to_ptr.vmem [resolvable:$true] %s17_s16  ;;  %s30_s19 = int_to_ptr.hbm [resolvable:$true] %s29_s19 }
   0x4   :  { %s221_s20 = smov 128   ;;  %s222_s21 = smov 8  }
   0x5   :  { %23 = dma.hbm_to_vmem [thread:$0]  %s16_s14, 256, %s18_s16, [#allocation3], %s221_s20, %s221_s20, %s222_s21  }
   0x6   :  { %s223_s22 = smov [#allocation5]  }
   0x7   :  { %s31_s23 = sshll.u32 %s223_s22, 4  ;;  %s32_s23 = int_to_ptr.vmem [resolvable:$true] %s31_s23 }
   0x8   :  { %34 = dma.hbm_to_vmem [thread:$0]  %s30_s19, 16, %s32_s23, [#allocation6]  }
   0x9   :  { %214 = dma.done.wait [#allocation3], 256  }
   0xa   :  { %215 = vsyncadd [#allocation3], 4294967040 }
   0xb   :  { %216 = dma.done.wait [#allocation6], 16  }
   0xc   :  { %217 = vsyncadd [#allocation6], 4294967280  ;;  %v45_v0 = vld [vmem:[#allocation2] sm:$0xff]  ;;  %v46_v1 = vld [vmem:[#allocation2 + $0x8] sm:$0xff]  ;;  %v224_v2 = vmov 128.0   ;;  %s225_s24 = smov [#allocation7]  }
   0xd   :  { %49 = vadd.xlane.f32.xlu0 %v45_v0  ;;  %136 = vrcp.f32 %v224_v2  ;;  %v134_v31 = vld [vmem:[#allocation5] ss:$0 sm:$0xff]  ;;  %v135_v35 = vld [vmem:[%s266_s2] ss:$0 sm:$0xff]  ;;  %s112_s25 = sshll.u32 %s225_s24, 4  ;;  %s114_s28 = sshll.u32 %s267_s3, 4  ;;  %s113_s25 = int_to_ptr.vmem [resolvable:$true] %s112_s25  ;;  %s115_s28 = int_to_ptr.hbm [resolvable:$true] %s114_s28 }
  0x13   :  { %v137_v3 = vpop.eup %136 }
  0x14   :  { %v54_v4 = vmul.f32 128.0, %v137_v3  ;;  %vm58_vm0 = vweird.f32 %v137_v3 }
  0x15   :  { %51 = vadd.xlane.f32.xlu0 %v46_v1 }
  0x16   :  { %v55_v5 = vsub.f32 1.0, %v54_v4 }
  0x18   :  { %v56_v6 = vmul.f32 %v137_v3, %v55_v5 }
  0x1a   :  { %v57_v7 = vadd.f32 %v137_v3, %v56_v6 }
  0x1c   :  { %v59_v8 = vsel %vm58_vm0, %v137_v3, %v57_v7 }
  0x80   :  { %v50_v9 = vpop.xlane.xlu0 %49 }
  0x81   :  { %v60_v10 = vmul.f32 %v59_v8, %v50_v9 }
  0x83   :  { %v62_v11 = vsub.f32 %v45_v0, %v60_v10 }
  0x85   :  { %v64_v12 = vmul.f32 %v62_v11, %v62_v11 }
  0x87   :  { %66 = vadd.xlane.f32.xlu1 %v64_v12 }
  0x88   :  { %v52_v13 = vpop.xlane.xlu0 %51 }
  0x89   :  { %v61_v14 = vmul.f32 %v59_v8, %v52_v13 }
  0x8b   :  { %v63_v15 = vsub.f32 %v46_v1, %v61_v14 }
  0x8d   :  { %v65_v16 = vmul.f32 %v63_v15, %v63_v15 }
  0x8f   :  { %68 = vadd.xlane.f32.xlu1 %v65_v16 }
  0xfa   :  { %v67_v17 = vpop.xlane.xlu1 %66 }
  0xfb   :  { %v70_v18 = vmul.f32 %v67_v17, %v59_v8 }
  0xfd   :  { %v72_v19 = vadd.f32 1e-05, %v70_v18 }
  0xff   :  { %138 = vrsqrt.f32 %v72_v19  ;;  %vm80_vm2 = vweird.f32 %v72_v19 }
 0x102   :  { %v69_v20 = vpop.xlane.xlu1 %68 }
 0x103   :  { %v71_v21 = vmul.f32 %v69_v20, %v59_v8 }
 0x105   :  { %v139_v22 = vpop.eup %138  ;;  %v73_v23 = vadd.f32 1e-05, %v71_v21 }
 0x106   :  { %v75_v24 = vmul.f32 %v139_v22, %v72_v19  ;;  %vm81_vm1 = vweird.f32 %v139_v22 }
 0x107   :  { %140 = vrsqrt.f32 %v73_v23  ;;  %vm82_vm3 = vmor %vm80_vm2, %vm81_vm1  ;;  %vm90_vm5 = vweird.f32 %v73_v23 }
 0x108   :  { %v76_v25 = vmul.f32 %v139_v22, %v75_v24 }
 0x10a   :  { %v77_v26 = vmul.f32 0.5, %v76_v25 }
 0x10c   :  { %v78_v27 = vsub.f32 1.5, %v77_v26 }
 0x10d   :  { %v141_v28 = vpop.eup %140 }
 0x10e   :  { %v79_v29 = vmul.f32 %v139_v22, %v78_v27  ;;  %v85_v30 = vmul.f32 %v141_v28, %v73_v23  ;;  %vm91_vm4 = vweird.f32 %v141_v28 }
 0x10f   :  { %vm92_vm6 = vmor %vm90_vm5, %vm91_vm4 }
 0x110   :  { %v83_v32 = vsel %vm82_vm3, %v139_v22, %v79_v29  ;;  %v86_v33 = vmul.f32 %v141_v28, %v85_v30 }
 0x111   :  { %v94_v34 = vmul.f32 %v83_v32, %v62_v11 }
 0x112   :  { %v87_v36 = vmul.f32 0.5, %v86_v33 }
 0x113   :  { %v99_v37 = vmul.f32 %v134_v31, %v94_v34 }
 0x114   :  { %v88_v38 = vsub.f32 1.5, %v87_v36 }
 0x115   :  { %v104_v39 = vadd.f32 %v135_v35, %v99_v37 }
 0x116   :  { %v89_v40 = vmul.f32 %v141_v28, %v88_v38 }
 0x117   :  { %106 = vst [vmem:[#allocation7] sm:$0xff] %v104_v39 }
 0x118   :  { %v93_v41 = vsel %vm92_vm6, %v141_v28, %v89_v40 }
 0x119   :  { %v95_v42 = vmul.f32 %v93_v41, %v63_v15 }
 0x11b   :  { %v100_v43 = vmul.f32 %v134_v31, %v95_v42 }
 0x11d   :  { %v105_v44 = vadd.f32 %v135_v35, %v100_v43 }
 0x11f   :  { %107 = vst [vmem:[#allocation7 + $0x8] sm:$0xff] %v105_v44 }
 0x120   :  { %120 = dma.vmem_to_hbm [thread:$0]  %s113_s25, 256, %s115_s28, [#allocation4], %s221_s20, %s221_s20, %s222_s21  }
 0x121   :  { %218 = dma.done.wait [#allocation4], 256  }
 0x122   :  { %219 = vsyncadd [#allocation4], 4294967040 }
 0x123   :  { %125 = vsyncpa [#allocation3], 1 }
 0x124   :  { %126 = vsyncpa [#allocation6], 1 }
 0x125   :  { %127 = vsyncpa [#allocation4], 1 }

</bundles_post_ra>
